<compile_context>
chip_gen: v5e
topology: v5e:2x2
jax: 0.10.0
libtpu: 0.0.40
codegen_flags: <defaults>
</compile_context>

<pallas_src>
import math

import jax
import jax.numpy as jnp
from jax.experimental import pallas as pl
from jax.experimental.pallas import tpu as pltpu

_LANE = 128
_TILE_B_CAP = 32768  # lanes per grid step; ~1.4 MiB HBM traffic / ~5-8 MiB VMEM per step


def _round_up(n, m):
    return ((n + m - 1) // m) * m


def _mlp_kernel(x_ref, w1_ref, b1_ref, w2_ref, b2_ref, w3_ref, b3_ref, o_ref):
    # One lane-dense batch tile per grid step; all three matmuls + activations fused.
    x = x_ref[...]                                                     # (10, TILE_B)

    h1 = jnp.dot(w1_ref[...], x, preferred_element_type=jnp.float32) + b1_ref[...]
    h1 = jnp.maximum(h1, 0.0)                                          # relu, (20, TILE_B)

    h2 = jnp.dot(w2_ref[...], h1, preferred_element_type=jnp.float32) + b2_ref[...]
    h2 = jnp.maximum(h2, 0.0)                                          # relu, (10, TILE_B)

    z = jnp.dot(w3_ref[...], h2, preferred_element_type=jnp.float32) + b3_ref[...]
    o_ref[...] = jax.nn.sigmoid(z)                                     # (1, TILE_B)


def opportunity_detector_forward_t(x_t, params, tile_b=None):
    """Lane-dense path. x_t: (10, B) float32 -> (1, B) float32."""
    w1, b1, w2, b2, w3, b3 = params
    F, B = x_t.shape

    if B < _LANE:
        # Tiny batch: a single block whose lane dim equals the full array dim
        # (allowed by the (8,128) layout rule); masking cost is irrelevant here.
        tile_b = B
    else:
        if tile_b is None:
            tile_b = _TILE_B_CAP
        tile_b = max(_LANE, _round_up(tile_b, _LANE))      # whole lanes per tile
        tile_b = min(tile_b, _round_up(B, _LANE))          # never exceed padded batch

    grid = (pl.cdiv(B, tile_b),)

    # Weights/biases: full-array blocks, constant index map -> VMEM-resident.
    const = lambda arr: pl.BlockSpec(arr.shape, lambda i: (0, 0))

    return pl.pallas_call(
        _mlp_kernel,
        out_shape=jax.ShapeDtypeStruct((1, B), jnp.float32),
        grid=grid,
        in_specs=[
            pl.BlockSpec((F, tile_b), lambda i: (0, i)),   # x^T: batch on lanes
            const(w1), const(b1),
            const(w2), const(b2),
            const(w3), const(b3),
        ],
        out_specs=pl.BlockSpec((1, tile_b), lambda i: (0, i)),  # lane-dense output row
        compiler_params=pltpu.CompilerParams(
            dimension_semantics=("parallel",),
            vmem_limit_bytes=32 * 1024 * 1024,
        ),
    )(x_t, w1, b1, w2, b2, w3, b3)


def opportunity_detector_forward(x, params, tile_b=None):
    """Module-compatible wrapper. x: (B, 10) float32 -> (B, 1) float32."""
    out_t = opportunity_detector_forward_t(jnp.transpose(x), params, tile_b=tile_b)
    return jnp.transpose(out_t)


def init_params(key):
    """Deterministic init mimicking nn.Linear default U(-1/sqrt(fan_in), 1/sqrt(fan_in)).

    Weights are stored torch-style (out, in); biases as (out, 1) columns so they
    broadcast along the lane (batch) axis inside the kernel.
    """
    def linear(key, fan_in, fan_out):
        kw, kb = jax.random.split(key)
        bound = 1.0 / math.sqrt(fan_in)
        w = jax.random.uniform(kw, (fan_out, fan_in), jnp.float32, -bound, bound)
        b = jax.random.uniform(kb, (fan_out, 1), jnp.float32, -bound, bound)
        return w, b

    k1, k2, k3 = jax.random.split(key, 3)
    w1, b1 = linear(k1, 10, 20)
    w2, b2 = linear(k2, 20, 10)
    w3, b3 = linear(k3, 10, 1)
    return (w1, b1, w2, b2, w3, b3)


def _reference(x, params):
    """Pure-JAX reference in the torch orientation: y = x @ W.T + b."""
    w1, b1, w2, b2, w3, b3 = params
    h1 = jnp.maximum(x @ w1.T + b1.T, 0.0)
    h2 = jnp.maximum(h1 @ w2.T + b2.T, 0.0)
    return jax.nn.sigmoid(h2 @ w3.T + b3.T)


if __name__ == "__main__":
    key = jax.random.PRNGKey(0)
    k_params, k_x1, k_x2 = jax.random.split(key, 3)

    params = init_params(k_params)

    # Small case: batch=8 -> single block whose lane dim equals the batch.
    x_small = jax.random.normal(k_x1, (8, 10), jnp.float32)
    out_small = jax.block_until_ready(opportunity_detector_forward(x_small, params))
    ref_small = _reference(x_small, params)
    assert out_small.shape == (8, 1)
    assert jnp.allclose(out_small, ref_small, atol=1e-5), "small-batch mismatch vs reference"

    # Multi-tile case: batch=200, tile_b=128 -> grid of 2 with a masked partial last tile.
    x_big = jax.random.normal(k_x2, (200, 10), jnp.float32)
    out_big = jax.block_until_ready(
        opportunity_detector_forward(x_big, params, tile_b=128)
    )
    ref_big = _reference(x_big, params)
    assert out_big.shape == (200, 1)
    assert jnp.allclose(out_big, ref_big, atol=1e-5), "multi-tile mismatch vs reference"

    print("KERNEL_OK")
</pallas_src>

<mosaic_0001>
module attributes {stable_mosaic.version = 11 : i64} {
  func.func @_mlp_kernel(%arg0: i32, %arg1: memref<10x8xf32, #tpu.memory_space<vmem>>, %arg2: memref<20x10xf32, #tpu.memory_space<vmem>>, %arg3: memref<20x1xf32, #tpu.memory_space<vmem>>, %arg4: memref<10x20xf32, #tpu.memory_space<vmem>>, %arg5: memref<10x1xf32, #tpu.memory_space<vmem>>, %arg6: memref<1x10xf32, #tpu.memory_space<vmem>>, %arg7: memref<1x1xf32, #tpu.memory_space<vmem>>, %arg8: memref<1x8xf32, #tpu.memory_space<vmem>>) attributes {dimension_semantics = [#tpu.dimension_semantics<parallel>], iteration_bounds = array<i64: 1>, scalar_prefetch = 0 : i64, scratch_operands = 0 : i64, tpu.core_type = #tpu.core_type<tc>, window_params = [{transform_indices = @transform_0, window_bounds = array<i64: 10, 8>}, {pipeline_mode = #tpu.pipeline_mode<synchronous>, transform_indices = @transform_1, window_bounds = array<i64: 20, 10>}, {pipeline_mode = #tpu.pipeline_mode<synchronous>, transform_indices = @transform_2, window_bounds = array<i64: 20, 1>}, {pipeline_mode = #tpu.pipeline_mode<synchronous>, transform_indices = @transform_3, window_bounds = array<i64: 10, 20>}, {pipeline_mode = #tpu.pipeline_mode<synchronous>, transform_indices = @transform_4, window_bounds = array<i64: 10, 1>}, {pipeline_mode = #tpu.pipeline_mode<synchronous>, transform_indices = @transform_5, window_bounds = array<i64: 1, 10>}, {pipeline_mode = #tpu.pipeline_mode<synchronous>, transform_indices = @transform_6, window_bounds = array<i64: 1, 1>}, {transform_indices = @transform_7, window_bounds = array<i64: 1, 8>}]} {
    %c0 = arith.constant 0 : index
    %c0_0 = arith.constant 0 : index
    %0 = vector.load %arg1[%c0, %c0_0] : memref<10x8xf32, #tpu.memory_space<vmem>>, vector<10x8xf32>
    %c0_1 = arith.constant 0 : index
    %c0_2 = arith.constant 0 : index
    %1 = vector.load %arg2[%c0_1, %c0_2] : memref<20x10xf32, #tpu.memory_space<vmem>>, vector<20x10xf32>
    %cst = arith.constant dense<0.000000e+00> : vector<20x8xf32>
    %2 = tpu.matmul %1, %0, %cst {dimension_numbers = #tpu.dot_dimension_numbers<[1], [0], [0], [1], [0, 0, 1, 1], [], []>} : vector<20x10xf32>, vector<10x8xf32>, vector<20x8xf32> -> vector<20x8xf32>
    %c0_3 = arith.constant 0 : index
    %c0_4 = arith.constant 0 : index
    %3 = vector.load %arg3[%c0_3, %c0_4] : memref<20x1xf32, #tpu.memory_space<vmem>>, vector<20x1xf32>
    %4 = vector.broadcast %3 : vector<20x1xf32> to vector<20x8xf32>
    %5 = arith.addf %2, %4 : vector<20x8xf32>
    %cst_5 = arith.constant 0.000000e+00 : f32
    %6 = vector.broadcast %cst_5 : f32 to vector<20x8xf32>
    %7 = arith.maximumf %5, %6 : vector<20x8xf32>
    %c0_6 = arith.constant 0 : index
    %c0_7 = arith.constant 0 : index
    %8 = vector.load %arg4[%c0_6, %c0_7] : memref<10x20xf32, #tpu.memory_space<vmem>>, vector<10x20xf32>
    %cst_8 = arith.constant dense<0.000000e+00> : vector<10x8xf32>
    %9 = tpu.matmul %8, %7, %cst_8 {dimension_numbers = #tpu.dot_dimension_numbers<[1], [0], [0], [1], [0, 0, 1, 1], [], []>} : vector<10x20xf32>, vector<20x8xf32>, vector<10x8xf32> -> vector<10x8xf32>
    %c0_9 = arith.constant 0 : index
    %c0_10 = arith.constant 0 : index
    %10 = vector.load %arg5[%c0_9, %c0_10] : memref<10x1xf32, #tpu.memory_space<vmem>>, vector<10x1xf32>
    %11 = vector.broadcast %10 : vector<10x1xf32> to vector<10x8xf32>
    %12 = arith.addf %9, %11 : vector<10x8xf32>
    %cst_11 = arith.constant 0.000000e+00 : f32
    %13 = vector.broadcast %cst_11 : f32 to vector<10x8xf32>
    %14 = arith.maximumf %12, %13 : vector<10x8xf32>
    %c0_12 = arith.constant 0 : index
    %c0_13 = arith.constant 0 : index
    %15 = vector.load %arg6[%c0_12, %c0_13] : memref<1x10xf32, #tpu.memory_space<vmem>>, vector<1x10xf32>
    %cst_14 = arith.constant dense<0.000000e+00> : vector<1x8xf32>
    %16 = tpu.matmul %15, %14, %cst_14 {dimension_numbers = #tpu.dot_dimension_numbers<[1], [0], [0], [1], [0, 0, 1, 1], [], []>} : vector<1x10xf32>, vector<10x8xf32>, vector<1x8xf32> -> vector<1x8xf32>
    %c0_15 = arith.constant 0 : index
    %c0_16 = arith.constant 0 : index
    %17 = vector.load %arg7[%c0_15, %c0_16] : memref<1x1xf32, #tpu.memory_space<vmem>>, vector<1x1xf32>
    %18 = vector.broadcast %17 : vector<1x1xf32> to vector<1x8xf32>
    %19 = arith.addf %16, %18 : vector<1x8xf32>
    %20 = arith.negf %19 : vector<1x8xf32>
    %21 = math.exp %20 : vector<1x8xf32>
    %cst_17 = arith.constant 1.000000e+00 : f32
    %22 = vector.broadcast %cst_17 : f32 to vector<1x8xf32>
    %23 = arith.addf %22, %21 : vector<1x8xf32>
    %24 = arith.divf %22, %23 : vector<1x8xf32>
    %c0_18 = arith.constant 0 : index
    %c0_19 = arith.constant 0 : index
    %25 = vector.load %arg8[%c0_18, %c0_19] : memref<1x8xf32, #tpu.memory_space<vmem>>, vector<1x8xf32>
    tpu.vector_store %arg8[%c0_18, %c0_19], %24 {strides = array<i32>} : memref<1x8xf32, #tpu.memory_space<vmem>>, vector<1x8xf32>,
    return
  }
  func.func @transform_0(%arg0: i32) -> (i32, i32) {
    %c0_i32 = arith.constant 0 : i32
    %c0_i32_0 = arith.constant 0 : i32
    return %c0_i32, %arg0 : i32, i32
  }
  func.func @transform_1(%arg0: i32) -> (i32, i32) {
    %c0_i32 = arith.constant 0 : i32
    %c0_i32_0 = arith.constant 0 : i32
    %c0_i32_1 = arith.constant 0 : i32
    return %c0_i32, %c0_i32_0 : i32, i32
  }
  func.func @transform_2(%arg0: i32) -> (i32, i32) {
    %c0_i32 = arith.constant 0 : i32
    %c0_i32_0 = arith.constant 0 : i32
    %c0_i32_1 = arith.constant 0 : i32
    return %c0_i32, %c0_i32_0 : i32, i32
  }
  func.func @transform_3(%arg0: i32) -> (i32, i32) {
    %c0_i32 = arith.constant 0 : i32
    %c0_i32_0 = arith.constant 0 : i32
    %c0_i32_1 = arith.constant 0 : i32
    return %c0_i32, %c0_i32_0 : i32, i32
  }
  func.func @transform_4(%arg0: i32) -> (i32, i32) {
    %c0_i32 = arith.constant 0 : i32
    %c0_i32_0 = arith.constant 0 : i32
    %c0_i32_1 = arith.constant 0 : i32
    return %c0_i32, %c0_i32_0 : i32, i32
  }
  func.func @transform_5(%arg0: i32) -> (i32, i32) {
    %c0_i32 = arith.constant 0 : i32
    %c0_i32_0 = arith.constant 0 : i32
    %c0_i32_1 = arith.constant 0 : i32
    return %c0_i32, %c0_i32_0 : i32, i32
  }
  func.func @transform_6(%arg0: i32) -> (i32, i32) {
    %c0_i32 = arith.constant 0 : i32
    %c0_i32_0 = arith.constant 0 : i32
    %c0_i32_1 = arith.constant 0 : i32
    return %c0_i32, %c0_i32_0 : i32, i32
  }
  func.func @transform_7(%arg0: i32) -> (i32, i32) {
    %c0_i32 = arith.constant 0 : i32
    %c0_i32_0 = arith.constant 0 : i32
    return %c0_i32, %arg0 : i32, i32
  }
}

</mosaic_0001>

<bundles_post_ra>
// kernel: tpu_custom_call.1
= control target key start
LH: loop header
LB: loop body
LE: loop exit
PB: predicated region body
PF: predicated region fallthrough
CT: control target
= control target key end

     0   :  { %s360_s0 = inlined_call_operand.vmem [shape: f32[10,8], index: 0, kind: input, shape index: {}]   ;;  %s361_s1 = inlined_call_operand.vmem [shape: f32[20,10], index: 1, kind: input, shape index: {}]   ;;  %s362_s2 = inlined_call_operand.vmem [shape: f32[20,1], index: 2, kind: input, shape index: {}]   ;;  %s363_s3 = inlined_call_operand.vmem [shape: f32[10,20], index: 3, kind: input, shape index: {}]   ;;  %s364_s4 = inlined_call_operand.vmem [shape: f32[10,1], index: 4, kind: input, shape index: {}]   ;;  %s365_s5 = inlined_call_operand.vmem [shape: f32[1,10], index: 5, kind: input, shape index: {}]   ;;  %s366_s6 = inlined_call_operand.<no memory space> [shape: f32[1,1], index: 6, kind: input, shape index: {}]   ;;  %s367_s7 = inlined_call_operand.hbm [shape: f32[1,8], index: 7, kind: output, shape index: {}]  }
   0x1   :  { %v12_v0 = vstv %s366_s6 }
   0x2   :  { %13 = vst [vmem:[#allocation2] sm:$0x1] %v12_v0 }
   0x3   :  { %v30_v1 = vld [vmem:[%s360_s0 + $0x8] sm:$0x3]  ;;  %vm62_vm0 = vcmask 1041408   ;;  %v29_v2 = vld [vmem:[%s360_s0] sm:$0xff]  ;;  %vm52_vm1 = vcmask 80896   ;;  %v266_v5 = vmov 0  }
   0x4   :  { %226 = vmatpush.msk.msra.mxu3 %vm62_vm0, %v30_v1  ;;  %v32_v3 = vld [vmem:[%s361_s1 + $0x8] sm:$0xff]  ;;  %v36_v4 = vld [vmem:[%s362_s2 + $0x10] sm:$0xf]  ;;  %216 = vmatpush.msk.msra.mxu0 %vm62_vm0, %v30_v1  ;;  %v31_v6 = vld [vmem:[%s361_s1] sm:$0xff] }
   0x5   :  { %233 = vset.pattern.permute.xlu0 %v266_v5  ;;  %234 = vset.pattern.permute.xlu1 %v266_v5  ;;  %v34_v7 = vld [vmem:[%s362_s2] sm:$0xff] }
   0x6   :  { %227 = vmatpush.msra.mxu3 %v29_v2  ;;  %49 = vperm.xlu0 %233, %v36_v4  }
   0x7   :  { %14 = vsyncpa [#allocation4], 0  ;;  %218 = vmatmul.msk.f32.vlgmr.msra.gmra.mxu3 %vm52_vm1, %v32_v3  ;;  %81 = vmatpush.msra.mxu0 %v29_v2  ;;  %v35_v8 = vld [vmem:[%s362_s2 + $0x8] sm:$0xff]  ;;  %v33_v9 = vld [vmem:[%s361_s1 + $0x10] sm:$0xf]  ;;  %vm116_vm2 = vcmask 1043456  }
   0x8   :  { %217 = vmatmul.msk.f32.vlgmr.msra.gmra.mxu0 %vm52_vm1, %v31_v6  ;;  %39 = vperm.xlu1 %234, %v34_v7   ;;  %v98_v10 = vld [vmem:[%s364_s4 + $0x8] sm:$0x3]  ;;  %v97_v11 = vld [vmem:[%s364_s4] sm:$0xff]  ;;  %vm109_vm3 = vcmask 162816   ;;  %s207_s26 = sshll.u32 %s367_s7, 4  ;;  %vm198_vm7 = vcmask 57344   ;;  %s208_s26 = int_to_ptr.hbm [resolvable:$true] %s207_s26 }
   0x9   :  { %235 = vset.pattern.permute.xlu2 %v266_v5  ;;  %v146_v12 = vld [vmem:[#allocation2] sm:$0x1]  ;;  %v96_v25 = vld [vmem:[%s363_s3 + $0x8] sm:$0x3] }
   0xa   :  { %101 = vperm.xlu2 %235, %v97_v11   ;;  %v95_v26 = vld [vmem:[%s363_s3] sm:$0xff]  ;;  %s267_s3 = smov [#allocation3]  }
   0xb   :  { %v145_v35 = vld [vmem:[%s365_s5] sm:$0x1]  ;;  %s205_s5 = sshll.u32 %s267_s3, 4  ;;  %s206_s5 = int_to_ptr.vmem [resolvable:$true] %s205_s5 }
   0xe   :  { %44 = vperm.xlu0 %233, %v35_v8  }
   0xf   :  { %219 = vmatmul.msk.f32.gmra.mxu3 %vm52_vm1, %v33_v9 }
  0x10   :  { %106 = vperm.xlu1 %234, %v98_v10  }
  0x12   :  { %149 = vperm.xlu2 %235, %v146_v12  }
  0x64   :  { %v102_v28 = vpop.permute.xlu2 %101 }
  0x6c   :  { %v150_v36 = vpop.permute.xlu2 %149 }
  0x6d   :  { %v152_v37 = vperm.slane %v150_v36, 0 }
  0x78   :  { %v50_v13 = vpop.permute.xlu0 %49 }
  0x7a   :  { %v40_v17 = vpop.permute.xlu1 %39 }
  0x80   :  { %v45_v15 = vpop.permute.xlu0 %44 }
  0x82   :  { %v107_v27 = vpop.permute.xlu1 %106 }
  0x85   :  { %v83_v16 = vpop.f32.mrf.mxu0 }
  0x86   :  { %v84_v21 = vadd.f32 %v83_v16, %v40_v17 }
  0x88   :  { %v92_v24 = vmax.f32 %v84_v21, 0.0 }
  0x8a   :  { %v86_v14 = vpop.f32.mrf.mxu3 }
  0x8b   :  { %v87_v19 = vadd.f32 %v86_v14, %v45_v15 }
  0x8d   :  { %v93_v23 = vmax.f32 %v87_v19, 0.0 }
  0x92   :  { %v89_v18 = vpop.f32.mrf.mxu3 }
  0x93   :  { %v90_v20 = vadd.f32 %v89_v18, %v50_v13 }
  0x95   :  { %v94_v22 = vmax.f32 %v90_v20, 0.0 }
  0x97   :  { %220 = vmatpush.msk.msrb.mxu0 %vm116_vm2, %v94_v22  ;;  %228 = vmatpush.msk.msra.mxu1 %vm116_vm2, %v94_v22 }
  0x99   :  { %134 = vmatpush.msrb.mxu0 %v93_v23  ;;  %229 = vmatpush.msra.mxu1 %v93_v23 }
  0x9b   :  { %230 = vmatpush.msra.mxu1 %v92_v24  ;;  %135 = vmatpush.msrb.mxu0 %v92_v24 }
  0x9c   :  { %222 = vmatmul.msk.f32.vlgmr.msra.gmra.mxu1 %vm109_vm3, %v96_v25  ;;  %221 = vmatmul.msk.f32.vlgmr.msrb.gmra.mxu0 %vm109_vm3, %v95_v26 }
 0x119   :  { %v140_v29 = vpop.f32.mrf.mxu1  ;;  %v137_v30 = vpop.f32.mrf.mxu0 }
 0x11a   :  { %v141_v31 = vadd.f32 %v140_v29, %v107_v27  ;;  %v138_v32 = vadd.f32 %v137_v30, %v102_v28 }
 0x11c   :  { %v144_v33 = vmax.f32 %v141_v31, 0.0  ;;  %v143_v34 = vmax.f32 %v138_v32, 0.0 }
 0x11e   :  { %223 = vmatpush.msk.msra.mxu2 %vm62_vm0, %v144_v33 }
 0x120   :  { %174 = vmatpush.msra.mxu2 %v143_v34 }
 0x121   :  { %224 = vmatmul.msk.f32.vlgmr.msra.gmra.mxu2 %vm52_vm1, %v145_v35 }
 0x1a4   :  { %v176_v38 = vpop.f32.mrf.mxu2 }
 0x1a5   :  { %v177_v39 = vadd.f32 %v176_v38, %v152_v37 }
 0x1a7   :  { %v225_v40 = vmul.f32 -1.442695, %v177_v39 }
 0x1a9   :  { %236 = vpow2.f32 %v225_v40 }
 0x1af   :  { %v237_v41 = vpop.eup %236 }
 0x1b0   :  { %v182_v42 = vadd.f32 1.0, %v237_v41 }
 0x1b2   :  { %238 = vrcp.f32 %v182_v42  ;;  %v194_v46 = vand.u32 2147483648, %v182_v42  ;;  %v192_v48 = vand.u32 2147483647, %v182_v42  ;;  %vm188_vm5 = vweird.f32 %v182_v42 }
 0x1b4   :  { %v195_v50 = vor.u32 1.1754944e-38, %v194_v46  ;;  %vm193_vm8 = vcmp.eq.f32.partialorder %v192_v48, 8.507059e+37 }
 0x1b8   :  { %v239_v43 = vpop.eup %238 }
 0x1b9   :  { %v184_v44 = vmul.f32 %v239_v43, %v182_v42  ;;  %vm189_vm4 = vweird.f32 %v239_v43 }
 0x1ba   :  { %vm190_vm6 = vmor %vm188_vm5, %vm189_vm4 }
 0x1bb   :  { %v185_v45 = vsub.f32 1.0, %v184_v44 }
 0x1bd   :  { %v186_v47 = vmul.f32 %v239_v43, %v185_v45 }
 0x1bf   :  { %v187_v49 = vadd.f32 %v239_v43, %v186_v47 }
 0x1c1   :  { %v191_v51 = vsel %vm190_vm6, %v239_v43, %v187_v49 }
 0x1c2   :  { %v196_v52 = vsel %vm193_vm8, %v195_v50, %v191_v51 }
 0x1c3   :  { %199 = vst.msk [vmem:[#allocation3] sm:$0x1] %vm198_vm7, %v196_v52 }
 0x1c4   :  { %210 = dma.vmem_to_hbm [thread:$0]  %s206_s5, 16, %s208_s26, [#allocation4]  }
 0x1c5   :  { %264 = dma.done.wait [#allocation4], 16  }
 0x1c6   :  { %265 = vsyncadd [#allocation4], 4294967280 }
 0x1c7   :  { %215 = vsyncpa [#allocation4], 1 }

</bundles_post_ra>
